<compile_context>
chip_gen: v5e
topology: v5e:2x2
jax: 0.10.0
libtpu: 0.0.40
codegen_flags: <defaults>
</compile_context>

<pallas_src>
import functools

import jax
import jax.numpy as jnp
from jax.experimental import pallas as pl
from jax.experimental.pallas import tpu as pltpu

_LANE = 128


def _round_up(x, m):
    return ((x + m - 1) // m) * m


def _fc8_kernel(x_ref, *refs, n_layers, compute_dtype):
    """refs = (w1, b1, ..., w9, b9, out_ref); all dims pre-padded to lane multiples."""
    out_ref = refs[-1]
    wb = refs[:-1]

    h = x_ref[...].astype(compute_dtype)
    for layer in range(n_layers):
        w = wb[2 * layer][...]                       # (d_in_pad, d_out_pad), compute_dtype
        b = wb[2 * layer + 1][...].astype(jnp.float32)  # (1, d_out_pad) -> broadcasts
        acc = jnp.dot(h, w, preferred_element_type=jnp.float32) + b
        if layer < n_layers - 1:                     # ReLU on hidden layers only
            acc = jnp.maximum(acc, 0.0)
            h = acc.astype(compute_dtype)
        else:
            h = acc                                  # final head: keep f32 accumulator
        # Dropout with p=0.0 (module defaults / eval) is the identity.
    out_ref[...] = h.astype(out_ref.dtype)


def fc8_forward(x, weights, biases, *, compute_dtype=jnp.float32, tile_b=None):
    """x: (B, in_features). weights[i]: (d_in_i, d_out_i) (== PyTorch W.T). biases[i]: (d_out_i,)."""
    B, in_features = x.shape
    n_layers = len(weights)
    out_features = weights[-1].shape[1]

    # --- lane-pad every feature dim to a multiple of 128 -------------------
    dims = [in_features] + [w.shape[1] for w in weights]
    dims_pad = [_round_up(d, _LANE) for d in dims]

    w_pad = []
    b_pad = []
    for i, (w, b) in enumerate(zip(weights, biases)):
        d_in, d_out = w.shape
        wp = jnp.pad(w, ((0, dims_pad[i] - d_in), (0, dims_pad[i + 1] - d_out)))
        bp = jnp.pad(b, (0, dims_pad[i + 1] - d_out)).reshape(1, -1)
        w_pad.append(wp.astype(compute_dtype))
        b_pad.append(bp.astype(jnp.float32))

    # --- batch tiling -------------------------------------------------------
    sublane = 16 if compute_dtype == jnp.bfloat16 else 8
    if tile_b is None:
        tile_b = min(256, _round_up(B, sublane))
    tile_b = _round_up(tile_b, sublane)
    B_pad = _round_up(B, tile_b)

    in_pad, out_pad = dims_pad[0], dims_pad[-1]
    x_p = jnp.pad(x, ((0, B_pad - B), (0, in_pad - in_features)))

    params = []
    for wp, bp in zip(w_pad, b_pad):
        params.append(wp)
        params.append(bp)

    grid = (B_pad // tile_b,)

    in_specs = [pl.BlockSpec((tile_b, in_pad), lambda i: (i, 0))]
    for p in params:
        # Full (untiled) parameter block; constant index_map => fetched once.
        in_specs.append(pl.BlockSpec(p.shape, lambda i: (0, 0)))
    out_specs = pl.BlockSpec((tile_b, out_pad), lambda i: (i, 0))

    # --- cost / VMEM hints --------------------------------------------------
    flops = 2 * B_pad * sum(dims_pad[i] * dims_pad[i + 1] for i in range(n_layers))
    param_bytes = sum(int(p.size) * p.dtype.itemsize for p in params)
    io_bytes = int(x_p.size) * x_p.dtype.itemsize + B_pad * out_pad * x.dtype.itemsize
    cost = pl.CostEstimate(flops=flops, transcendentals=0,
                           bytes_accessed=param_bytes + io_bytes)

    # double-buffered x/out tiles + (double-buffered) params + f32 intermediates.
    est = (2 * tile_b * (in_pad + out_pad) * 4
           + 2 * param_bytes
           + 4 * tile_b * max(dims_pad) * 4)
    vmem_limit = int(min(128 * 2**20, max(32 * 2**20, 2 * est)))

    kernel = functools.partial(_fc8_kernel, n_layers=n_layers,
                               compute_dtype=compute_dtype)

    out_padded = pl.pallas_call(
        kernel,
        out_shape=jax.ShapeDtypeStruct((B_pad, out_pad), x.dtype),
        grid_spec=pltpu.PrefetchScalarGridSpec(
            num_scalar_prefetch=0,
            grid=grid,
            in_specs=in_specs,
            out_specs=out_specs,
        ),
        compiler_params=pltpu.CompilerParams(
            dimension_semantics=("parallel",),
            vmem_limit_bytes=vmem_limit,
        ),
        cost_estimate=cost,
    )(x_p, *params)

    return out_padded[:B, :out_features]


def init_fc8_params(key, dims):
    """dims = [in_features, h1..h8, out_features]. PyTorch-style uniform init."""
    weights, biases = [], []
    for i in range(len(dims) - 1):
        d_in, d_out = dims[i], dims[i + 1]
        key, kw, kb = jax.random.split(key, 3)
        bound = 1.0 / jnp.sqrt(jnp.float32(d_in))
        w = jax.random.uniform(kw, (d_in, d_out), jnp.float32, -bound, bound)  # == PyTorch W.T
        b = jax.random.uniform(kb, (d_out,), jnp.float32, -bound, bound)
        weights.append(w)
        biases.append(b)
    return weights, biases


def fc8_reference(x, weights, biases):
    """Plain-JAX reference of the PyTorch forward (eval mode / p=0 dropout)."""
    h = x
    for i, (w, b) in enumerate(zip(weights, biases)):
        h = h @ w + b
        if i < len(weights) - 1:
            h = jnp.maximum(h, 0.0)
    return h


if __name__ == "__main__":
    key = jax.random.PRNGKey(0)

    batch = 16
    in_features = 16
    hidden = [32, 32, 32, 32, 32, 32, 32, 32]
    out_features = 8
    dims = [in_features] + hidden + [out_features]

    key, kx, kp = jax.random.split(key, 3)
    x = jax.random.normal(kx, (batch, in_features), jnp.float32)
    weights, biases = init_fc8_params(kp, dims)

    ref = fc8_reference(x, weights, biases)

    # Exact-semantics path (f32 operands, f32 accumulate).
    out_f32 = jax.block_until_ready(fc8_forward(x, weights, biases))
    assert out_f32.shape == (batch, out_features)
    assert jnp.allclose(out_f32, ref, atol=1e-4, rtol=1e-4), "f32 mismatch vs reference"

    # Fast path: bf16 MXU operands with f32 accumulation (looser tolerance).
    out_bf16 = jax.block_until_ready(
        fc8_forward(x, weights, biases, compute_dtype=jnp.bfloat16))
    assert out_bf16.shape == (batch, out_features)
    assert jnp.allclose(out_bf16, ref, atol=1.5e-1, rtol=1e-1), "bf16 mismatch vs reference"

    print("KERNEL_OK")
</pallas_src>

<mosaic_0001>
module attributes {stable_mosaic.version = 11 : i64} {
  func.func @_fc8_kernel(%arg0: i32, %arg1: memref<16x128xf32, #tpu.memory_space<vmem>>, %arg2: memref<128x128xf32, #tpu.memory_space<vmem>>, %arg3: memref<1x128xf32, #tpu.memory_space<vmem>>, %arg4: memref<128x128xf32, #tpu.memory_space<vmem>>, %arg5: memref<1x128xf32, #tpu.memory_space<vmem>>, %arg6: memref<128x128xf32, #tpu.memory_space<vmem>>, %arg7: memref<1x128xf32, #tpu.memory_space<vmem>>, %arg8: memref<128x128xf32, #tpu.memory_space<vmem>>, %arg9: memref<1x128xf32, #tpu.memory_space<vmem>>, %arg10: memref<128x128xf32, #tpu.memory_space<vmem>>, %arg11: memref<1x128xf32, #tpu.memory_space<vmem>>, %arg12: memref<128x128xf32, #tpu.memory_space<vmem>>, %arg13: memref<1x128xf32, #tpu.memory_space<vmem>>, %arg14: memref<128x128xf32, #tpu.memory_space<vmem>>, %arg15: memref<1x128xf32, #tpu.memory_space<vmem>>, %arg16: memref<128x128xf32, #tpu.memory_space<vmem>>, %arg17: memref<1x128xf32, #tpu.memory_space<vmem>>, %arg18: memref<128x128xf32, #tpu.memory_space<vmem>>, %arg19: memref<1x128xf32, #tpu.memory_space<vmem>>, %arg20: memref<16x128xf32, #tpu.memory_space<vmem>>) attributes {dimension_semantics = [#tpu.dimension_semantics<parallel>], iteration_bounds = array<i64: 1>, scalar_prefetch = 0 : i64, scratch_operands = 0 : i64, tpu.core_type = #tpu.core_type<tc>, window_params = [{transform_indices = @transform_0, window_bounds = array<i64: 16, 128>}, {pipeline_mode = #tpu.pipeline_mode<synchronous>, transform_indices = @transform_1, window_bounds = array<i64: 128, 128>}, {pipeline_mode = #tpu.pipeline_mode<synchronous>, transform_indices = @transform_2, window_bounds = array<i64: 1, 128>}, {pipeline_mode = #tpu.pipeline_mode<synchronous>, transform_indices = @transform_3, window_bounds = array<i64: 128, 128>}, {pipeline_mode = #tpu.pipeline_mode<synchronous>, transform_indices = @transform_4, window_bounds = array<i64: 1, 128>}, {pipeline_mode = #tpu.pipeline_mode<synchronous>, transform_indices = @transform_5, window_bounds = array<i64: 128, 128>}, {pipeline_mode = #tpu.pipeline_mode<synchronous>, transform_indices = @transform_6, window_bounds = array<i64: 1, 128>}, {pipeline_mode = #tpu.pipeline_mode<synchronous>, transform_indices = @transform_7, window_bounds = array<i64: 128, 128>}, {pipeline_mode = #tpu.pipeline_mode<synchronous>, transform_indices = @transform_8, window_bounds = array<i64: 1, 128>}, {pipeline_mode = #tpu.pipeline_mode<synchronous>, transform_indices = @transform_9, window_bounds = array<i64: 128, 128>}, {pipeline_mode = #tpu.pipeline_mode<synchronous>, transform_indices = @transform_10, window_bounds = array<i64: 1, 128>}, {pipeline_mode = #tpu.pipeline_mode<synchronous>, transform_indices = @transform_11, window_bounds = array<i64: 128, 128>}, {pipeline_mode = #tpu.pipeline_mode<synchronous>, transform_indices = @transform_12, window_bounds = array<i64: 1, 128>}, {pipeline_mode = #tpu.pipeline_mode<synchronous>, transform_indices = @transform_13, window_bounds = array<i64: 128, 128>}, {pipeline_mode = #tpu.pipeline_mode<synchronous>, transform_indices = @transform_14, window_bounds = array<i64: 1, 128>}, {pipeline_mode = #tpu.pipeline_mode<synchronous>, transform_indices = @transform_15, window_bounds = array<i64: 128, 128>}, {pipeline_mode = #tpu.pipeline_mode<synchronous>, transform_indices = @transform_16, window_bounds = array<i64: 1, 128>}, {pipeline_mode = #tpu.pipeline_mode<synchronous>, transform_indices = @transform_17, window_bounds = array<i64: 128, 128>}, {pipeline_mode = #tpu.pipeline_mode<synchronous>, transform_indices = @transform_18, window_bounds = array<i64: 1, 128>}, {transform_indices = @transform_19, window_bounds = array<i64: 16, 128>}]} {
    %c0 = arith.constant 0 : index
    %c0_0 = arith.constant 0 : index
    %0 = vector.load %arg1[%c0, %c0_0] : memref<16x128xf32, #tpu.memory_space<vmem>>, vector<16x128xf32>
    %c0_1 = arith.constant 0 : index
    %c0_2 = arith.constant 0 : index
    %1 = vector.load %arg2[%c0_1, %c0_2] : memref<128x128xf32, #tpu.memory_space<vmem>>, vector<128x128xf32>
    %c0_3 = arith.constant 0 : index
    %c0_4 = arith.constant 0 : index
    %2 = vector.load %arg3[%c0_3, %c0_4] : memref<1x128xf32, #tpu.memory_space<vmem>>, vector<1x128xf32>
    %cst = arith.constant dense<0.000000e+00> : vector<16x128xf32>
    %3 = tpu.matmul %0, %1, %cst {dimension_numbers = #tpu.dot_dimension_numbers<[1], [0], [0], [1], [0, 0, 1, 1], [], []>} : vector<16x128xf32>, vector<128x128xf32>, vector<16x128xf32> -> vector<16x128xf32>
    %4 = vector.broadcast %2 : vector<1x128xf32> to vector<16x128xf32>
    %5 = arith.addf %3, %4 : vector<16x128xf32>
    %cst_5 = arith.constant 0.000000e+00 : f32
    %6 = vector.broadcast %cst_5 : f32 to vector<16x128xf32>
    %7 = arith.maximumf %5, %6 : vector<16x128xf32>
    %c0_6 = arith.constant 0 : index
    %c0_7 = arith.constant 0 : index
    %8 = vector.load %arg4[%c0_6, %c0_7] : memref<128x128xf32, #tpu.memory_space<vmem>>, vector<128x128xf32>
    %c0_8 = arith.constant 0 : index
    %c0_9 = arith.constant 0 : index
    %9 = vector.load %arg5[%c0_8, %c0_9] : memref<1x128xf32, #tpu.memory_space<vmem>>, vector<1x128xf32>
    %cst_10 = arith.constant dense<0.000000e+00> : vector<16x128xf32>
    %10 = tpu.matmul %7, %8, %cst_10 {dimension_numbers = #tpu.dot_dimension_numbers<[1], [0], [0], [1], [0, 0, 1, 1], [], []>} : vector<16x128xf32>, vector<128x128xf32>, vector<16x128xf32> -> vector<16x128xf32>
    %11 = vector.broadcast %9 : vector<1x128xf32> to vector<16x128xf32>
    %12 = arith.addf %10, %11 : vector<16x128xf32>
    %cst_11 = arith.constant 0.000000e+00 : f32
    %13 = vector.broadcast %cst_11 : f32 to vector<16x128xf32>
    %14 = arith.maximumf %12, %13 : vector<16x128xf32>
    %c0_12 = arith.constant 0 : index
    %c0_13 = arith.constant 0 : index
    %15 = vector.load %arg6[%c0_12, %c0_13] : memref<128x128xf32, #tpu.memory_space<vmem>>, vector<128x128xf32>
    %c0_14 = arith.constant 0 : index
    %c0_15 = arith.constant 0 : index
    %16 = vector.load %arg7[%c0_14, %c0_15] : memref<1x128xf32, #tpu.memory_space<vmem>>, vector<1x128xf32>
    %cst_16 = arith.constant dense<0.000000e+00> : vector<16x128xf32>
    %17 = tpu.matmul %14, %15, %cst_16 {dimension_numbers = #tpu.dot_dimension_numbers<[1], [0], [0], [1], [0, 0, 1, 1], [], []>} : vector<16x128xf32>, vector<128x128xf32>, vector<16x128xf32> -> vector<16x128xf32>
    %18 = vector.broadcast %16 : vector<1x128xf32> to vector<16x128xf32>
    %19 = arith.addf %17, %18 : vector<16x128xf32>
    %cst_17 = arith.constant 0.000000e+00 : f32
    %20 = vector.broadcast %cst_17 : f32 to vector<16x128xf32>
    %21 = arith.maximumf %19, %20 : vector<16x128xf32>
    %c0_18 = arith.constant 0 : index
    %c0_19 = arith.constant 0 : index
    %22 = vector.load %arg8[%c0_18, %c0_19] : memref<128x128xf32, #tpu.memory_space<vmem>>, vector<128x128xf32>
    %c0_20 = arith.constant 0 : index
    %c0_21 = arith.constant 0 : index
    %23 = vector.load %arg9[%c0_20, %c0_21] : memref<1x128xf32, #tpu.memory_space<vmem>>, vector<1x128xf32>
    %cst_22 = arith.constant dense<0.000000e+00> : vector<16x128xf32>
    %24 = tpu.matmul %21, %22, %cst_22 {dimension_numbers = #tpu.dot_dimension_numbers<[1], [0], [0], [1], [0, 0, 1, 1], [], []>} : vector<16x128xf32>, vector<128x128xf32>, vector<16x128xf32> -> vector<16x128xf32>
    %25 = vector.broadcast %23 : vector<1x128xf32> to vector<16x128xf32>
    %26 = arith.addf %24, %25 : vector<16x128xf32>
    %cst_23 = arith.constant 0.000000e+00 : f32
    %27 = vector.broadcast %cst_23 : f32 to vector<16x128xf32>
    %28 = arith.maximumf %26, %27 : vector<16x128xf32>
    %c0_24 = arith.constant 0 : index
    %c0_25 = arith.constant 0 : index
    %29 = vector.load %arg10[%c0_24, %c0_25] : memref<128x128xf32, #tpu.memory_space<vmem>>, vector<128x128xf32>
    %c0_26 = arith.constant 0 : index
    %c0_27 = arith.constant 0 : index
    %30 = vector.load %arg11[%c0_26, %c0_27] : memref<1x128xf32, #tpu.memory_space<vmem>>, vector<1x128xf32>
    %cst_28 = arith.constant dense<0.000000e+00> : vector<16x128xf32>
    %31 = tpu.matmul %28, %29, %cst_28 {dimension_numbers = #tpu.dot_dimension_numbers<[1], [0], [0], [1], [0, 0, 1, 1], [], []>} : vector<16x128xf32>, vector<128x128xf32>, vector<16x128xf32> -> vector<16x128xf32>
    %32 = vector.broadcast %30 : vector<1x128xf32> to vector<16x128xf32>
    %33 = arith.addf %31, %32 : vector<16x128xf32>
    %cst_29 = arith.constant 0.000000e+00 : f32
    %34 = vector.broadcast %cst_29 : f32 to vector<16x128xf32>
    %35 = arith.maximumf %33, %34 : vector<16x128xf32>
    %c0_30 = arith.constant 0 : index
    %c0_31 = arith.constant 0 : index
    %36 = vector.load %arg12[%c0_30, %c0_31] : memref<128x128xf32, #tpu.memory_space<vmem>>, vector<128x128xf32>
    %c0_32 = arith.constant 0 : index
    %c0_33 = arith.constant 0 : index
    %37 = vector.load %arg13[%c0_32, %c0_33] : memref<1x128xf32, #tpu.memory_space<vmem>>, vector<1x128xf32>
    %cst_34 = arith.constant dense<0.000000e+00> : vector<16x128xf32>
    %38 = tpu.matmul %35, %36, %cst_34 {dimension_numbers = #tpu.dot_dimension_numbers<[1], [0], [0], [1], [0, 0, 1, 1], [], []>} : vector<16x128xf32>, vector<128x128xf32>, vector<16x128xf32> -> vector<16x128xf32>
    %39 = vector.broadcast %37 : vector<1x128xf32> to vector<16x128xf32>
    %40 = arith.addf %38, %39 : vector<16x128xf32>
    %cst_35 = arith.constant 0.000000e+00 : f32
    %41 = vector.broadcast %cst_35 : f32 to vector<16x128xf32>
    %42 = arith.maximumf %40, %41 : vector<16x128xf32>
    %c0_36 = arith.constant 0 : index
    %c0_37 = arith.constant 0 : index
    %43 = vector.load %arg14[%c0_36, %c0_37] : memref<128x128xf32, #tpu.memory_space<vmem>>, vector<128x128xf32>
    %c0_38 = arith.constant 0 : index
    %c0_39 = arith.constant 0 : index
    %44 = vector.load %arg15[%c0_38, %c0_39] : memref<1x128xf32, #tpu.memory_space<vmem>>, vector<1x128xf32>
    %cst_40 = arith.constant dense<0.000000e+00> : vector<16x128xf32>
    %45 = tpu.matmul %42, %43, %cst_40 {dimension_numbers = #tpu.dot_dimension_numbers<[1], [0], [0], [1], [0, 0, 1, 1], [], []>} : vector<16x128xf32>, vector<128x128xf32>, vector<16x128xf32> -> vector<16x128xf32>
    %46 = vector.broadcast %44 : vector<1x128xf32> to vector<16x128xf32>
    %47 = arith.addf %45, %46 : vector<16x128xf32>
    %cst_41 = arith.constant 0.000000e+00 : f32
    %48 = vector.broadcast %cst_41 : f32 to vector<16x128xf32>
    %49 = arith.maximumf %47, %48 : vector<16x128xf32>
    %c0_42 = arith.constant 0 : index
    %c0_43 = arith.constant 0 : index
    %50 = vector.load %arg16[%c0_42, %c0_43] : memref<128x128xf32, #tpu.memory_space<vmem>>, vector<128x128xf32>
    %c0_44 = arith.constant 0 : index
    %c0_45 = arith.constant 0 : index
    %51 = vector.load %arg17[%c0_44, %c0_45] : memref<1x128xf32, #tpu.memory_space<vmem>>, vector<1x128xf32>
    %cst_46 = arith.constant dense<0.000000e+00> : vector<16x128xf32>
    %52 = tpu.matmul %49, %50, %cst_46 {dimension_numbers = #tpu.dot_dimension_numbers<[1], [0], [0], [1], [0, 0, 1, 1], [], []>} : vector<16x128xf32>, vector<128x128xf32>, vector<16x128xf32> -> vector<16x128xf32>
    %53 = vector.broadcast %51 : vector<1x128xf32> to vector<16x128xf32>
    %54 = arith.addf %52, %53 : vector<16x128xf32>
    %cst_47 = arith.constant 0.000000e+00 : f32
    %55 = vector.broadcast %cst_47 : f32 to vector<16x128xf32>
    %56 = arith.maximumf %54, %55 : vector<16x128xf32>
    %c0_48 = arith.constant 0 : index
    %c0_49 = arith.constant 0 : index
    %57 = vector.load %arg18[%c0_48, %c0_49] : memref<128x128xf32, #tpu.memory_space<vmem>>, vector<128x128xf32>
    %c0_50 = arith.constant 0 : index
    %c0_51 = arith.constant 0 : index
    %58 = vector.load %arg19[%c0_50, %c0_51] : memref<1x128xf32, #tpu.memory_space<vmem>>, vector<1x128xf32>
    %cst_52 = arith.constant dense<0.000000e+00> : vector<16x128xf32>
    %59 = tpu.matmul %56, %57, %cst_52 {dimension_numbers = #tpu.dot_dimension_numbers<[1], [0], [0], [1], [0, 0, 1, 1], [], []>} : vector<16x128xf32>, vector<128x128xf32>, vector<16x128xf32> -> vector<16x128xf32>
    %60 = vector.broadcast %58 : vector<1x128xf32> to vector<16x128xf32>
    %61 = arith.addf %59, %60 : vector<16x128xf32>
    %c0_53 = arith.constant 0 : index
    %c0_54 = arith.constant 0 : index
    %62 = vector.load %arg20[%c0_53, %c0_54] : memref<16x128xf32, #tpu.memory_space<vmem>>, vector<16x128xf32>
    tpu.vector_store %arg20[%c0_53, %c0_54], %61 {strides = array<i32>} : memref<16x128xf32, #tpu.memory_space<vmem>>, vector<16x128xf32>,
    return
  }
  func.func @transform_0(%arg0: i32) -> (i32, i32) {
    %c0_i32 = arith.constant 0 : i32
    %c0_i32_0 = arith.constant 0 : i32
    return %arg0, %c0_i32 : i32, i32
  }
  func.func @transform_1(%arg0: i32) -> (i32, i32) {
    %c0_i32 = arith.constant 0 : i32
    %c0_i32_0 = arith.constant 0 : i32
    %c0_i32_1 = arith.constant 0 : i32
    return %c0_i32, %c0_i32_0 : i32, i32
  }
  func.func @transform_2(%arg0: i32) -> (i32, i32) {
    %c0_i32 = arith.constant 0 : i32
    %c0_i32_0 = arith.constant 0 : i32
    %c0_i32_1 = arith.constant 0 : i32
    return %c0_i32, %c0_i32_0 : i32, i32
  }
  func.func @transform_3(%arg0: i32) -> (i32, i32) {
    %c0_i32 = arith.constant 0 : i32
    %c0_i32_0 = arith.constant 0 : i32
    %c0_i32_1 = arith.constant 0 : i32
    return %c0_i32, %c0_i32_0 : i32, i32
  }
  func.func @transform_4(%arg0: i32) -> (i32, i32) {
    %c0_i32 = arith.constant 0 : i32
    %c0_i32_0 = arith.constant 0 : i32
    %c0_i32_1 = arith.constant 0 : i32
    return %c0_i32, %c0_i32_0 : i32, i32
  }
  func.func @transform_5(%arg0: i32) -> (i32, i32) {
    %c0_i32 = arith.constant 0 : i32
    %c0_i32_0 = arith.constant 0 : i32
    %c0_i32_1 = arith.constant 0 : i32
    return %c0_i32, %c0_i32_0 : i32, i32
  }
  func.func @transform_6(%arg0: i32) -> (i32, i32) {
    %c0_i32 = arith.constant 0 : i32
    %c0_i32_0 = arith.constant 0 : i32
    %c0_i32_1 = arith.constant 0 : i32
    return %c0_i32, %c0_i32_0 : i32, i32
  }
  func.func @transform_7(%arg0: i32) -> (i32, i32) {
    %c0_i32 = arith.constant 0 : i32
    %c0_i32_0 = arith.constant 0 : i32
    %c0_i32_1 = arith.constant 0 : i32
    return %c0_i32, %c0_i32_0 : i32, i32
  }
  func.func @transform_8(%arg0: i32) -> (i32, i32) {
    %c0_i32 = arith.constant 0 : i32
    %c0_i32_0 = arith.constant 0 : i32
    %c0_i32_1 = arith.constant 0 : i32
    return %c0_i32, %c0_i32_0 : i32, i32
  }
  func.func @transform_9(%arg0: i32) -> (i32, i32) {
    %c0_i32 = arith.constant 0 : i32
    %c0_i32_0 = arith.constant 0 : i32
    %c0_i32_1 = arith.constant 0 : i32
    return %c0_i32, %c0_i32_0 : i32, i32
  }
  func.func @transform_10(%arg0: i32) -> (i32, i32) {
    %c0_i32 = arith.constant 0 : i32
    %c0_i32_0 = arith.constant 0 : i32
    %c0_i32_1 = arith.constant 0 : i32
    return %c0_i32, %c0_i32_0 : i32, i32
  }
  func.func @transform_11(%arg0: i32) -> (i32, i32) {
    %c0_i32 = arith.constant 0 : i32
    %c0_i32_0 = arith.constant 0 : i32
    %c0_i32_1 = arith.constant 0 : i32
    return %c0_i32, %c0_i32_0 : i32, i32
  }
  func.func @transform_12(%arg0: i32) -> (i32, i32) {
    %c0_i32 = arith.constant 0 : i32
    %c0_i32_0 = arith.constant 0 : i32
    %c0_i32_1 = arith.constant 0 : i32
    return %c0_i32, %c0_i32_0 : i32, i32
  }
  func.func @transform_13(%arg0: i32) -> (i32, i32) {
    %c0_i32 = arith.constant 0 : i32
    %c0_i32_0 = arith.constant 0 : i32
    %c0_i32_1 = arith.constant 0 : i32
    return %c0_i32, %c0_i32_0 : i32, i32
  }
  func.func @transform_14(%arg0: i32) -> (i32, i32) {
    %c0_i32 = arith.constant 0 : i32
    %c0_i32_0 = arith.constant 0 : i32
    %c0_i32_1 = arith.constant 0 : i32
    return %c0_i32, %c0_i32_0 : i32, i32
  }
  func.func @transform_15(%arg0: i32) -> (i32, i32) {
    %c0_i32 = arith.constant 0 : i32
    %c0_i32_0 = arith.constant 0 : i32
    %c0_i32_1 = arith.constant 0 : i32
    return %c0_i32, %c0_i32_0 : i32, i32
  }
  func.func @transform_16(%arg0: i32) -> (i32, i32) {
    %c0_i32 = arith.constant 0 : i32
    %c0_i32_0 = arith.constant 0 : i32
    %c0_i32_1 = arith.constant 0 : i32
    return %c0_i32, %c0_i32_0 : i32, i32
  }
  func.func @transform_17(%arg0: i32) -> (i32, i32) {
    %c0_i32 = arith.constant 0 : i32
    %c0_i32_0 = arith.constant 0 : i32
    %c0_i32_1 = arith.constant 0 : i32
    return %c0_i32, %c0_i32_0 : i32, i32
  }
  func.func @transform_18(%arg0: i32) -> (i32, i32) {
    %c0_i32 = arith.constant 0 : i32
    %c0_i32_0 = arith.constant 0 : i32
    %c0_i32_1 = arith.constant 0 : i32
    return %c0_i32, %c0_i32_0 : i32, i32
  }
  func.func @transform_19(%arg0: i32) -> (i32, i32) {
    %c0_i32 = arith.constant 0 : i32
    %c0_i32_0 = arith.constant 0 : i32
    return %arg0, %c0_i32 : i32, i32
  }
}

</mosaic_0001>

<bundles_post_ra>
// kernel: tpu_custom_call.1
= control target key start
LH: loop header
LB: loop body
LE: loop exit
PB: predicated region body
PF: predicated region fallthrough
CT: control target
= control target key end

     0   :  { %s1172_s0 = inlined_call_operand.hbm [shape: f32[16,128], index: 0, kind: input, shape index: {}]   ;;  %s1173_s1 = inlined_call_operand.hbm [shape: f32[128,128], index: 1, kind: input, shape index: {}]   ;;  %s1174_s2 = inlined_call_operand.vmem [shape: f32[1,128], index: 2, kind: input, shape index: {}]   ;;  %s1175_s3 = inlined_call_operand.hbm [shape: f32[128,128], index: 3, kind: input, shape index: {}]   ;;  %s1176_s4 = inlined_call_operand.vmem [shape: f32[1,128], index: 4, kind: input, shape index: {}]   ;;  %s1177_s5 = inlined_call_operand.hbm [shape: f32[128,128], index: 5, kind: input, shape index: {}]   ;;  %s1178_s6 = inlined_call_operand.vmem [shape: f32[1,128], index: 6, kind: input, shape index: {}]   ;;  %s1179_s7 = inlined_call_operand.hbm [shape: f32[128,128], index: 7, kind: input, shape index: {}]   ;;  %s1180_s8 = inlined_call_operand.vmem [shape: f32[1,128], index: 8, kind: input, shape index: {}]   ;;  %s1181_s9 = inlined_call_operand.hbm [shape: f32[128,128], index: 9, kind: input, shape index: {}]   ;;  %s1182_s10 = inlined_call_operand.vmem [shape: f32[1,128], index: 10, kind: input, shape index: {}]   ;;  %s1183_s11 = inlined_call_operand.hbm [shape: f32[128,128], index: 11, kind: input, shape index: {}]   ;;  %s1184_s12 = inlined_call_operand.vmem [shape: f32[1,128], index: 12, kind: input, shape index: {}]   ;;  %s1185_s13 = inlined_call_operand.hbm [shape: f32[128,128], index: 13, kind: input, shape index: {}]   ;;  %s1186_s14 = inlined_call_operand.vmem [shape: f32[1,128], index: 14, kind: input, shape index: {}]   ;;  %s1187_s15 = inlined_call_operand.hbm [shape: f32[128,128], index: 15, kind: input, shape index: {}]   ;;  %s1188_s16 = inlined_call_operand.vmem [shape: f32[1,128], index: 16, kind: input, shape index: {}]   ;;  %s1189_s17 = inlined_call_operand.hbm [shape: f32[128,128], index: 17, kind: input, shape index: {}]   ;;  %s1190_s18 = inlined_call_operand.vmem [shape: f32[1,128], index: 18, kind: input, shape index: {}]   ;;  %s1191_s19 = inlined_call_operand.hbm [shape: f32[16,128], index: 19, kind: output, shape index: {}]  }
   0x1   :  { %1192 = sst [smem:[#allocation27_spill]] %s1172_s0 }
   0x2   :  { %1193 = sst [smem:[#allocation28_spill]] %s1173_s1 }
   0x3   :  { %1194 = sst [smem:[#allocation29_spill]] %s1174_s2 }
   0x4   :  { %1195 = sst [smem:[#allocation30_spill]] %s1175_s3 }
   0x5   :  { %24 = vsyncpa [#allocation3], 0 }
   0x6   :  { %25 = vsyncpa [#allocation6], 0 }
   0x7   :  { %26 = vsyncpa [#allocation9], 0 }
   0x8   :  { %27 = vsyncpa [#allocation12], 0 }
   0x9   :  { %28 = vsyncpa [#allocation15], 0 }
   0xa   :  { %29 = vsyncpa [#allocation18], 0 }
   0xb   :  { %30 = vsyncpa [#allocation4], 0  ;;  %s1196_s20 = sld [smem:[#allocation28_spill]]  ;;  %s966_s1 = smov [#allocation5]  }
   0xc   :  { %s50_s22 = sshll.u32 %s966_s1, 4  ;;  %s78_s24 = sshll.u32 %s1177_s5, 4  ;;  %s51_s22 = int_to_ptr.vmem [resolvable:$true] %s50_s22  ;;  %s79_s24 = int_to_ptr.hbm [resolvable:$true] %s78_s24 }
   0xd   :  { %s967_s25 = smov 128   ;;  %s968_s3 = smov 8  }
   0xe   :  { %s969_s26 = smov [#allocation8]   ;;  %s108_s0 = sshll.u32 %s1181_s9, 4  ;;  %s109_s0 = int_to_ptr.hbm [resolvable:$true] %s108_s0 }
   0xf   :  { %s80_s27 = sshll.u32 %s969_s26, 4  ;;  %s970_s1 = smov [#allocation11]   ;;  %s81_s27 = int_to_ptr.vmem [resolvable:$true] %s80_s27 }
  0x10   :  { %86 = dma.hbm_to_vmem [thread:$0]  %s79_s24, 2048, %s81_s27, [#allocation9], %s967_s25, %s967_s25, %s968_s3  }
  0x11   :  { %s48_s21 = sshll.u32 %s1196_s20, 4  ;;  %s138_s20 = sshll.u32 %s1185_s13, 4  ;;  %s49_s21 = int_to_ptr.hbm [resolvable:$true] %s48_s21  ;;  %s139_s20 = int_to_ptr.hbm [resolvable:$true] %s138_s20 }
  0x12   :  { %56 = dma.hbm_to_vmem [thread:$0]  %s49_s21, 2048, %s51_s22, [#allocation6], %s967_s25, %s967_s25, %s968_s3  }
  0x13   :  { %s110_s2 = sshll.u32 %s970_s1, 4  ;;  %s971_s21 = smov [#allocation14]   ;;  %s111_s2 = int_to_ptr.vmem [resolvable:$true] %s110_s2 }
  0x14   :  { %116 = dma.hbm_to_vmem [thread:$0]  %s109_s0, 2048, %s111_s2, [#allocation12], %s967_s25, %s967_s25, %s968_s3  }
  0x15   :  { %s140_s9 = sshll.u32 %s971_s21, 4  ;;  %s1197_s26 = sld [smem:[#allocation27_spill]]  ;;  %s141_s9 = int_to_ptr.vmem [resolvable:$true] %s140_s9 }
  0x16   :  { %146 = dma.hbm_to_vmem [thread:$0]  %s139_s20, 2048, %s141_s9, [#allocation15], %s967_s25, %s967_s25, %s968_s3  }
  0x17   :  { %s1198_s27 = sld [smem:[#allocation30_spill]]  ;;  %s972_s5 = smov [#allocation2]  }
  0x18   :  { %s37_s30 = sshll.u32 %s972_s5, 4  ;;  %s973_s0 = smov [#allocation7]   ;;  %s38_s30 = int_to_ptr.vmem [resolvable:$true] %s37_s30 }
  0x19   :  { %s65_s1 = sshll.u32 %s973_s0, 4  ;;  %s93_s22 = sshll.u32 %s1179_s7, 4  ;;  %s66_s1 = int_to_ptr.vmem [resolvable:$true] %s65_s1  ;;  %s94_s22 = int_to_ptr.hbm [resolvable:$true] %s93_s22 }
  0x1a   :  { %s123_s23 = sshll.u32 %s1183_s11, 4  ;;  %s153_s5 = sshll.u32 %s1187_s15, 4  ;;  %s124_s23 = int_to_ptr.hbm [resolvable:$true] %s123_s23  ;;  %s154_s5 = int_to_ptr.hbm [resolvable:$true] %s153_s5 }
  0x1b   :  { %s35_s28 = sshll.u32 %s1197_s26, 4  ;;  %s974_s26 = smov [#allocation10]   ;;  %s36_s28 = int_to_ptr.hbm [resolvable:$true] %s35_s28 }
  0x1c   :  { %43 = dma.hbm_to_vmem [thread:$0]  %s36_s28, 256, %s38_s30, [#allocation3], %s967_s25, %s967_s25, %s968_s3  }
  0x1d   :  { %s63_s29 = sshll.u32 %s1198_s27, 4  ;;  %s95_s13 = sshll.u32 %s974_s26, 4  ;;  %s64_s29 = int_to_ptr.hbm [resolvable:$true] %s63_s29  ;;  %s96_s13 = int_to_ptr.vmem [resolvable:$true] %s95_s13 }
  0x1e   :  { %71 = dma.hbm_to_vmem [thread:$0]  %s64_s29, 2048, %s66_s1, [#allocation6], %s967_s25, %s967_s25, %s968_s3  }
  0x1f   :  { %101 = dma.hbm_to_vmem [thread:$0]  %s94_s22, 2048, %s96_s13, [#allocation9], %s967_s25, %s967_s25, %s968_s3  }
  0x20   :  { %s975_s28 = smov [#allocation13]   ;;  %s168_s30 = sshll.u32 %s1189_s17, 4  ;;  %s169_s30 = int_to_ptr.hbm [resolvable:$true] %s168_s30 }
  0x21   :  { %s125_s7 = sshll.u32 %s975_s28, 4  ;;  %s976_s0 = smov [#allocation16]   ;;  %s126_s7 = int_to_ptr.vmem [resolvable:$true] %s125_s7 }
  0x22   :  { %131 = dma.hbm_to_vmem [thread:$0]  %s124_s23, 2048, %s126_s7, [#allocation12], %s967_s25, %s967_s25, %s968_s3  }
  0x23   :  { %s155_s1 = sshll.u32 %s976_s0, 4  ;;  %s977_s2 = smov [#allocation17]   ;;  %s156_s1 = int_to_ptr.vmem [resolvable:$true] %s155_s1 }
  0x24   :  { %161 = dma.hbm_to_vmem [thread:$0]  %s154_s5, 2048, %s156_s1, [#allocation15], %s967_s25, %s967_s25, %s968_s3  }
  0x25   :  { %s170_s15 = sshll.u32 %s977_s2, 4  ;;  %s171_s15 = int_to_ptr.vmem [resolvable:$true] %s170_s15 }
  0x26   :  { %176 = dma.hbm_to_vmem [thread:$0]  %s169_s30, 2048, %s171_s15, [#allocation18], %s967_s25, %s967_s25, %s968_s3  }
  0x27   :  { %952 = dma.done.wait [#allocation3], 256  }
  0x28   :  { %953 = vsyncadd [#allocation3], 4294967040 }
  0x29   :  { %954 = dma.done.wait [#allocation6], 4096  }
  0x2a   :  { %955 = vsyncadd [#allocation6], 4294963200 }
  0x2b   :  { %956 = dma.done.wait [#allocation9], 4096  }
  0x2c   :  { %957 = vsyncadd [#allocation9], 4294963200 }
  0x2d   :  { %958 = dma.done.wait [#allocation12], 4096  }
  0x2e   :  { %959 = vsyncadd [#allocation12], 4294963200 }
  0x2f   :  { %960 = dma.done.wait [#allocation15], 4096  }
  0x30   :  { %961 = vsyncadd [#allocation15], 4294963200 }
  0x31   :  { %962 = dma.done.wait [#allocation18], 2048  }
  0x32   :  { %963 = vsyncadd [#allocation18], 4294965248  ;;  %v236_v0 = vld [vmem:[#allocation5 + $0x78] sm:$0xff]  ;;  %v235_v1 = vld [vmem:[#allocation5 + $0x70] sm:$0xff]  ;;  %s1199_s22 = sld [smem:[#allocation29_spill]]  ;;  %s978_s11 = smov [#allocation19]  }
  0x33   :  { %241 = vmatpush.msra.mxu0 %v236_v0  ;;  %v234_v2 = vld [vmem:[#allocation5 + $0x68] sm:$0xff]  ;;  %v233_v3 = vld [vmem:[#allocation5 + $0x60] sm:$0xff]  ;;  %v232_v4 = vld [vmem:[#allocation5 + $0x58] sm:$0xff]  ;;  %s630_s29 = sshll.u32 %s978_s11, 4  ;;  %s631_s29 = int_to_ptr.vmem [resolvable:$true] %s630_s29 }
  0x34   :  { %v231_v5 = vld [vmem:[#allocation5 + $0x50] sm:$0xff]  ;;  %v281_v6 = vld [vmem:[#allocation7 + $0x78] sm:$0xff]  ;;  %v230_v8 = vld [vmem:[#allocation5 + $0x48] sm:$0xff] }
  0x35   :  { %242 = vmatpush.msra.mxu0 %v235_v1  ;;  %v280_v7 = vld [vmem:[#allocation7 + $0x70] sm:$0xff]  ;;  %286 = vmatpush.msra.mxu1 %v281_v6  ;;  %v279_v9 = vld [vmem:[#allocation7 + $0x68] sm:$0xff]  ;;  %v229_v10 = vld [vmem:[#allocation5 + $0x40] sm:$0xff] }
  0x36   :  { %v278_v11 = vld [vmem:[#allocation7 + $0x60] sm:$0xff]  ;;  %v228_v12 = vld [vmem:[#allocation5 + $0x38] sm:$0xff]  ;;  %v227_v14 = vld [vmem:[#allocation5 + $0x30] sm:$0xff] }
  0x37   :  { %243 = vmatpush.msra.mxu0 %v234_v2  ;;  %287 = vmatpush.msra.mxu1 %v280_v7  ;;  %v277_v13 = vld [vmem:[#allocation7 + $0x58] sm:$0xff]  ;;  %v276_v15 = vld [vmem:[#allocation7 + $0x50] sm:$0xff]  ;;  %v226_v16 = vld [vmem:[#allocation5 + $0x28] sm:$0xff] }
  0x38   :  { %v275_v17 = vld [vmem:[#allocation7 + $0x48] sm:$0xff]  ;;  %v225_v18 = vld [vmem:[#allocation5 + $0x20] sm:$0xff]  ;;  %v224_v20 = vld [vmem:[#allocation5 + $0x18] sm:$0xff] }
  0x39   :  { %244 = vmatpush.msra.mxu0 %v233_v3  ;;  %288 = vmatpush.msra.mxu1 %v279_v9  ;;  %v274_v19 = vld [vmem:[#allocation7 + $0x40] sm:$0xff]  ;;  %v273_v21 = vld [vmem:[#allocation7 + $0x38] sm:$0xff]  ;;  %v223_v22 = vld [vmem:[#allocation5 + $0x10] sm:$0xff] }
  0x3a   :  { %v272_v23 = vld [vmem:[#allocation7 + $0x30] sm:$0xff]  ;;  %v222_v24 = vld [vmem:[#allocation5 + $0x8] sm:$0xff]  ;;  %v221_v26 = vld [vmem:[#allocation5] sm:$0xff] }
  0x3b   :  { %245 = vmatpush.msra.mxu0 %v232_v4  ;;  %289 = vmatpush.msra.mxu1 %v278_v11  ;;  %v271_v25 = vld [vmem:[#allocation7 + $0x28] sm:$0xff]  ;;  %v270_v27 = vld [vmem:[#allocation7 + $0x20] sm:$0xff]  ;;  %v219_v28 = vld [vmem:[#allocation2] sm:$0xff] }
  0x3c   :  { %v269_v29 = vld [vmem:[#allocation7 + $0x18] sm:$0xff]  ;;  %v268_v31 = vld [vmem:[#allocation7 + $0x10] sm:$0xff]  ;;  %v267_v32 = vld [vmem:[#allocation7 + $0x8] sm:$0xff] }
  0x3d   :  { %246 = vmatpush.msra.mxu0 %v231_v5  ;;  %290 = vmatpush.msra.mxu1 %v277_v13  ;;  %v220_v30 = vld [vmem:[#allocation2 + $0x8] sm:$0xff]  ;;  %v266_v33 = vld [vmem:[#allocation7] sm:$0xff]  ;;  %v325_v35 = vld [vmem:[#allocation8 + $0x70] sm:$0xff] }
  0x3e   :  { %v326_v34 = vld [vmem:[#allocation8 + $0x78] sm:$0xff]  ;;  %v324_v36 = vld [vmem:[#allocation8 + $0x68] sm:$0xff]  ;;  %v323_v37 = vld [vmem:[#allocation8 + $0x60] sm:$0xff] }
  0x3f   :  { %247 = vmatpush.msra.mxu0 %v230_v8  ;;  %291 = vmatpush.msra.mxu1 %v276_v15  ;;  %v322_v38 = vld [vmem:[#allocation8 + $0x58] sm:$0xff]  ;;  %v321_v39 = vld [vmem:[#allocation8 + $0x50] sm:$0xff]  ;;  %v320_v40 = vld [vmem:[#allocation8 + $0x48] sm:$0xff] }
  0x40   :  { %331 = vmatpush.msra.mxu2 %v326_v34  ;;  %v319_v41 = vld [vmem:[#allocation8 + $0x40] sm:$0xff]  ;;  %v318_v42 = vld [vmem:[#allocation8 + $0x38] sm:$0xff]  ;;  %v679_v43 = vld [vmem:[%s1199_s22] ss:$0 sm:$0xff] }
  0x41   :  { %248 = vmatpush.msra.mxu0 %v229_v10  ;;  %292 = vmatpush.msra.mxu1 %v275_v17  ;;  %v317_v44 = vld [vmem:[#allocation8 + $0x30] sm:$0xff]  ;;  %v316_v45 = vld [vmem:[#allocation8 + $0x28] sm:$0xff]  ;;  %v315_v48 = vld [vmem:[#allocation8 + $0x20] sm:$0xff] }
  0x42   :  { %332 = vmatpush.msra.mxu2 %v325_v35  ;;  %v314_v50 = vld [vmem:[#allocation8 + $0x18] sm:$0xff]  ;;  %v313_v54 = vld [vmem:[#allocation8 + $0x10] sm:$0xff]  ;;  %v312_v55 = vld [vmem:[#allocation8 + $0x8] sm:$0xff] }
  0x43   :  { %249 = vmatpush.msra.mxu0 %v228_v12  ;;  %293 = vmatpush.msra.mxu1 %v274_v19  ;;  %v311_v56 = vld [vmem:[#allocation8] sm:$0xff]  ;;  %v371_v57 = vld [vmem:[#allocation10 + $0x78] sm:$0xff]  ;;  %v370_v58 = vld [vmem:[#allocation10 + $0x70] sm:$0xff] }
  0x44   :  { %333 = vmatpush.msra.mxu2 %v324_v36  ;;  %376 = vmatpush.msra.mxu3 %v371_v57  ;;  %v369_v59 = vld [vmem:[#allocation10 + $0x68] sm:$0xff]  ;;  %v368_v60 = vld [vmem:[#allocation10 + $0x60] sm:$0xff]  ;;  %v367_v61 = vld [vmem:[#allocation10 + $0x58] sm:$0xff] }
  0x45   :  { %250 = vmatpush.msra.mxu0 %v227_v14  ;;  %294 = vmatpush.msra.mxu1 %v273_v21  ;;  %v366_v62 = vld [vmem:[#allocation10 + $0x50] sm:$0xff]  ;;  %v365_v63 = vld [vmem:[#allocation10 + $0x48] sm:$0xff]  ;;  %v364_v0 = vld [vmem:[#allocation10 + $0x40] sm:$0xff] }
  0x46   :  { %334 = vmatpush.msra.mxu2 %v323_v37  ;;  %377 = vmatpush.msra.mxu3 %v370_v58  ;;  %v363_v1 = vld [vmem:[#allocation10 + $0x38] sm:$0xff]  ;;  %v680_v2 = vld [vmem:[%s1176_s4] ss:$0 sm:$0xff]  ;;  %v361_v4 = vld [vmem:[#allocation10 + $0x28] sm:$0xff] }
  0x47   :  { %251 = vmatpush.msra.mxu0 %v226_v16  ;;  %295 = vmatpush.msra.mxu1 %v272_v23  ;;  %v362_v3 = vld [vmem:[#allocation10 + $0x30] sm:$0xff]  ;;  %v360_v7 = vld [vmem:[#allocation10 + $0x20] sm:$0xff]  ;;  %v359_v9 = vld [vmem:[#allocation10 + $0x18] sm:$0xff] }
  0x48   :  { %335 = vmatpush.msra.mxu2 %v322_v38  ;;  %378 = vmatpush.msra.mxu3 %v369_v59  ;;  %v358_v13 = vld [vmem:[#allocation10 + $0x10] sm:$0xff]  ;;  %v357_v14 = vld [vmem:[#allocation10 + $0x8] sm:$0xff]  ;;  %v356_v15 = vld [vmem:[#allocation10] sm:$0xff] }
  0x49   :  { %252 = vmatpush.msra.mxu0 %v225_v18  ;;  %296 = vmatpush.msra.mxu1 %v271_v25  ;;  %v416_v16 = vld [vmem:[#allocation11 + $0x78] sm:$0xff]  ;;  %v415_v17 = vld [vmem:[#allocation11 + $0x70] sm:$0xff]  ;;  %v414_v18 = vld [vmem:[#allocation11 + $0x68] sm:$0xff] }
  0x4a   :  { %336 = vmatpush.msra.mxu2 %v321_v39  ;;  %379 = vmatpush.msra.mxu3 %v368_v60  ;;  %v413_v19 = vld [vmem:[#allocation11 + $0x60] sm:$0xff]  ;;  %v411_v21 = vld [vmem:[#allocation11 + $0x50] sm:$0xff]  ;;  %v402_v37 = vld [vmem:[#allocation11 + $0x8] sm:$0xff] }
  0x4b   :  { %253 = vmatpush.msra.mxu0 %v224_v20  ;;  %297 = vmatpush.msra.mxu1 %v270_v27  ;;  %v412_v20 = vld [vmem:[#allocation11 + $0x58] sm:$0xff]  ;;  %v409_v23 = vld [vmem:[#allocation11 + $0x40] sm:$0xff]  ;;  %v681_v25 = vld [vmem:[%s1178_s6] ss:$0 sm:$0xff] }
  0x4c   :  { %337 = vmatpush.msra.mxu2 %v320_v40  ;;  %380 = vmatpush.msra.mxu3 %v367_v61  ;;  %v406_v27 = vld [vmem:[#allocation11 + $0x28] sm:$0xff]  ;;  %v403_v36 = vld [vmem:[#allocation11 + $0x10] sm:$0xff]  ;;  %v401_v38 = vld [vmem:[#allocation11] sm:$0xff] }
  0x4d   :  { %254 = vmatpush.msra.mxu0 %v223_v22  ;;  %298 = vmatpush.msra.mxu1 %v269_v29  ;;  %v410_v22 = vld [vmem:[#allocation11 + $0x48] sm:$0xff]  ;;  %v461_v39 = vld [vmem:[#allocation13 + $0x78] sm:$0xff]  ;;  %v460_v40 = vld [vmem:[#allocation13 + $0x70] sm:$0xff] }
  0x4e   :  { %338 = vmatpush.msra.mxu2 %v319_v41  ;;  %381 = vmatpush.msra.mxu3 %v366_v62  ;;  %v459_v41 = vld [vmem:[#allocation13 + $0x68] sm:$0xff]  ;;  %v448_v59 = vld [vmem:[#allocation13 + $0x10] sm:$0xff]  ;;  %v446_v61 = vld [vmem:[#allocation13] sm:$0xff] }
  0x4f   :  { %255 = vmatpush.msra.mxu0 %v222_v24  ;;  %299 = vmatpush.msra.mxu1 %v268_v31  ;;  %v408_v24 = vld [vmem:[#allocation11 + $0x38] sm:$0xff]  ;;  %v447_v60 = vld [vmem:[#allocation13 + $0x8] sm:$0xff] }
  0x50   :  { %339 = vmatpush.msra.mxu2 %v318_v42  ;;  %382 = vmatpush.msra.mxu3 %v365_v63  ;;  %v458_v42 = vld [vmem:[#allocation13 + $0x60] sm:$0xff]  ;;  %v506_v62 = vld [vmem:[#allocation14 + $0x78] sm:$0xff]  ;;  %v505_v63 = vld [vmem:[#allocation14 + $0x70] sm:$0xff] }
  0x51   :  { %256 = vmatpush.msra.mxu0 %v221_v26  ;;  %300 = vmatpush.msra.mxu1 %v267_v32  ;;  %v407_v26 = vld [vmem:[#allocation11 + $0x30] sm:$0xff]  ;;  %v404_v32 = vld [vmem:[#allocation11 + $0x18] sm:$0xff] }
  0x52   :  { %257 = vmatmul.f32.vlgmr.msra.gmra.mxu0 %v219_v28  ;;  %340 = vmatpush.msra.mxu2 %v317_v44  ;;  %v456_v44 = vld [vmem:[#allocation13 + $0x50] sm:$0xff] }
  0x53   :  { %301 = vmatpush.msra.mxu1 %v266_v33  ;;  %383 = vmatpush.msra.mxu3 %v364_v0  ;;  %v504_v0 = vld [vmem:[#allocation14 + $0x68] sm:$0xff] }
  0x54   :  { %341 = vmatpush.msra.mxu2 %v316_v45  ;;  %421 = vmatpush.msrb.mxu0 %v416_v16  ;;  %v455_v45 = vld [vmem:[#allocation13 + $0x48] sm:$0xff] }
  0x55   :  { %384 = vmatpush.msra.mxu3 %v363_v1  ;;  %466 = vmatpush.msrb.mxu1 %v461_v39  ;;  %v503_v1 = vld [vmem:[#allocation14 + $0x60] sm:$0xff] }
  0x56   :  { %342 = vmatpush.msra.mxu2 %v315_v48  ;;  %422 = vmatpush.msrb.mxu0 %v415_v17  ;;  %v682_v48 = vld [vmem:[%s1180_s8] ss:$0 sm:$0xff] }
  0x57   :  { %385 = vmatpush.msra.mxu3 %v362_v3  ;;  %467 = vmatpush.msrb.mxu1 %v460_v40  ;;  %v501_v3 = vld [vmem:[#allocation14 + $0x50] sm:$0xff] }
  0x58   :  { %343 = vmatpush.msra.mxu2 %v314_v50  ;;  %423 = vmatpush.msrb.mxu0 %v414_v18  ;;  %v451_v50 = vld [vmem:[#allocation13 + $0x28] sm:$0xff]  ;;  %v493_v18 = vld [vmem:[#allocation14 + $0x10] sm:$0xff] }
  0x59   :  { %386 = vmatpush.msra.mxu3 %v361_v4  ;;  %468 = vmatpush.msrb.mxu1 %v459_v41  ;;  %v500_v4 = vld [vmem:[#allocation14 + $0x48] sm:$0xff]  ;;  %v538_v41 = vld [vmem:[#allocation16 + $0x10] sm:$0xff] }
  0x5a   :  { %260 = vmatmul.f32.gmra.mxu0 %v220_v30  ;;  %344 = vmatpush.msra.mxu2 %v313_v54  ;;  %v405_v30 = vld [vmem:[#allocation11 + $0x20] sm:$0xff] }
  0x5b   :  { %387 = vmatpush.msra.mxu3 %v360_v7  ;;  %424 = vmatpush.msrb.mxu0 %v413_v19  ;;  %v683_v7 = vld [vmem:[%s1182_s10] ss:$0 sm:$0xff]  ;;  %v492_v19 = vld [vmem:[#allocation14 + $0x8] sm:$0xff] }
  0x5c   :  { %345 = vmatpush.msra.mxu2 %v312_v55  ;;  %469 = vmatpush.msrb.mxu1 %v458_v42  ;;  %v449_v55 = vld [vmem:[#allocation13 + $0x18] sm:$0xff]  ;;  %v537_v42 = vld [vmem:[#allocation16 + $0x8] sm:$0xff] }
  0x5d   :  { %388 = vmatpush.msra.mxu3 %v359_v9  ;;  %425 = vmatpush.msrb.mxu0 %v412_v20  ;;  %v496_v9 = vld [vmem:[#allocation14 + $0x28] sm:$0xff]  ;;  %v491_v20 = vld [vmem:[#allocation14] sm:$0xff] }
  0x5e   :  { %346 = vmatpush.msra.mxu2 %v311_v56 }
  0x5f   :  { %389 = vmatpush.msra.mxu3 %v358_v13  ;;  %426 = vmatpush.msrb.mxu0 %v411_v21  ;;  %v551_v21 = vld [vmem:[#allocation16 + $0x78] sm:$0xff] }
  0x60   :  { %511 = vmatpush.msrb.mxu2 %v506_v62 }
  0x61   :  { %390 = vmatpush.msra.mxu3 %v357_v14  ;;  %427 = vmatpush.msrb.mxu0 %v410_v22  ;;  %v494_v14 = vld [vmem:[#allocation14 + $0x18] sm:$0xff]  ;;  %v550_v22 = vld [vmem:[#allocation16 + $0x70] sm:$0xff] }
  0x62   :  { %512 = vmatpush.msrb.mxu2 %v505_v63 }
  0x63   :  { %391 = vmatpush.msra.mxu3 %v356_v15  ;;  %428 = vmatpush.msrb.mxu0 %v409_v23  ;;  %v549_v23 = vld [vmem:[#allocation16 + $0x68] sm:$0xff] }
  0x64   :  { %513 = vmatpush.msrb.mxu2 %v504_v0  ;;  %v583_v0 = vld [vmem:[#allocation17 + $0x10] sm:$0xff] }
  0x65   :  { %429 = vmatpush.msrb.mxu0 %v408_v24  ;;  %556 = vmatpush.msrb.mxu3 %v551_v21  ;;  %v548_v24 = vld [vmem:[#allocation16 + $0x60] sm:$0xff] }
  0x66   :  { %514 = vmatpush.msrb.mxu2 %v503_v1  ;;  %v582_v1 = vld [vmem:[#allocation17 + $0x8] sm:$0xff] }
  0x67   :  { %430 = vmatpush.msrb.mxu0 %v407_v26  ;;  %557 = vmatpush.msrb.mxu3 %v550_v22  ;;  %v546_v26 = vld [vmem:[#allocation16 + $0x50] sm:$0xff] }
  0x69   :  { %431 = vmatpush.msrb.mxu0 %v406_v27  ;;  %558 = vmatpush.msrb.mxu3 %v549_v23  ;;  %v545_v27 = vld [vmem:[#allocation16 + $0x48] sm:$0xff] }
  0x6b   :  { %432 = vmatpush.msrb.mxu0 %v405_v30  ;;  %559 = vmatpush.msrb.mxu3 %v548_v24  ;;  %v684_v30 = vld [vmem:[%s1184_s12] ss:$0 sm:$0xff] }
  0x6d   :  { %433 = vmatpush.msrb.mxu0 %v404_v32  ;;  %v541_v32 = vld [vmem:[#allocation16 + $0x28] sm:$0xff] }
  0x6f   :  { %434 = vmatpush.msrb.mxu0 %v403_v36 }
  0x71   :  { %435 = vmatpush.msrb.mxu0 %v402_v37  ;;  %v539_v37 = vld [vmem:[#allocation16 + $0x18] sm:$0xff] }
  0x73   :  { %436 = vmatpush.msrb.mxu0 %v401_v38 }
  0xcf   :  { %v258_v46 = vpop.f32.mrf.mxu0 }
  0xd0   :  { %v259_v47 = vadd.f32 %v679_v43, %v258_v46  ;;  %v454_v46 = vld [vmem:[#allocation13 + $0x40] sm:$0xff] }
  0xd2   :  { %v264_v49 = vmax.f32 %v259_v47, 0.0  ;;  %v453_v47 = vld [vmem:[#allocation13 + $0x38] sm:$0xff] }
  0xd4   :  { %302 = vmatmul.f32.vlgmr.msra.gmra.mxu1 %v264_v49  ;;  %v452_v49 = vld [vmem:[#allocation13 + $0x30] sm:$0xff] }
  0xd7   :  { %v261_v51 = vpop.f32.mrf.mxu0 }
  0xd8   :  { %v262_v52 = vadd.f32 %v679_v43, %v261_v51  ;;  %v457_v43 = vld [vmem:[#allocation13 + $0x58] sm:$0xff] }
  0xd9   :  { %470 = vmatpush.msrb.mxu1 %v457_v43  ;;  %v536_v43 = vld [vmem:[#allocation16] sm:$0xff] }
  0xda   :  { %v265_v53 = vmax.f32 %v262_v52, 0.0 }
  0xdb   :  { %471 = vmatpush.msrb.mxu1 %v456_v44  ;;  %v596_v44 = vld [vmem:[#allocation17 + $0x78] sm:$0xff] }
  0xdc   :  { %305 = vmatmul.f32.gmra.mxu1 %v265_v53  ;;  %v450_v53 = vld [vmem:[#allocation13 + $0x20] sm:$0xff]  ;;  %601 = vmatpush.msra.mxu0 %v596_v44 }
  0xdd   :  { %472 = vmatpush.msrb.mxu1 %v455_v45  ;;  %v595_v45 = vld [vmem:[#allocation17 + $0x70] sm:$0xff] }
  0xde   :  { %602 = vmatpush.msra.mxu0 %v595_v45 }
  0xdf   :  { %473 = vmatpush.msrb.mxu1 %v454_v46  ;;  %v594_v46 = vld [vmem:[#allocation17 + $0x68] sm:$0xff] }
  0xe0   :  { %603 = vmatpush.msra.mxu0 %v594_v46 }
  0xe1   :  { %474 = vmatpush.msrb.mxu1 %v453_v47  ;;  %v593_v47 = vld [vmem:[#allocation17 + $0x60] sm:$0xff] }
  0xe2   :  { %604 = vmatpush.msra.mxu0 %v593_v47 }
  0xe3   :  { %475 = vmatpush.msrb.mxu1 %v452_v49  ;;  %v591_v49 = vld [vmem:[#allocation17 + $0x50] sm:$0xff] }
  0xe5   :  { %476 = vmatpush.msrb.mxu1 %v451_v50  ;;  %v590_v50 = vld [vmem:[#allocation17 + $0x48] sm:$0xff] }
  0xe7   :  { %477 = vmatpush.msrb.mxu1 %v450_v53  ;;  %v685_v53 = vld [vmem:[%s1186_s14] ss:$0 sm:$0xff] }
  0xe9   :  { %478 = vmatpush.msrb.mxu1 %v449_v55  ;;  %v586_v55 = vld [vmem:[#allocation17 + $0x28] sm:$0xff] }
  0xeb   :  { %479 = vmatpush.msrb.mxu1 %v448_v59 }
  0xed   :  { %480 = vmatpush.msrb.mxu1 %v447_v60  ;;  %v584_v60 = vld [vmem:[#allocation17 + $0x18] sm:$0xff] }
  0xef   :  { %481 = vmatpush.msrb.mxu1 %v446_v61 }
  0xf1   :  { %650 = vmatpush.msra.mxu1 %v596_v44 }
  0xf3   :  { %651 = vmatpush.msra.mxu1 %v595_v45 }
  0xf5   :  { %652 = vmatpush.msra.mxu1 %v594_v46 }
  0xf7   :  { %653 = vmatpush.msra.mxu1 %v593_v47 }
 0x151   :  { %v303_v5 = vpop.f32.mrf.mxu1 }
 0x152   :  { %v304_v6 = vadd.f32 %v680_v2, %v303_v5  ;;  %v499_v5 = vld [vmem:[#allocation14 + $0x40] sm:$0xff] }
 0x154   :  { %v309_v8 = vmax.f32 %v304_v6, 0.0  ;;  %v498_v6 = vld [vmem:[#allocation14 + $0x38] sm:$0xff] }
 0x156   :  { %347 = vmatmul.f32.vlgmr.msra.gmra.mxu2 %v309_v8  ;;  %v497_v8 = vld [vmem:[#allocation14 + $0x30] sm:$0xff] }
 0x159   :  { %v306_v10 = vpop.f32.mrf.mxu1 }
 0x15a   :  { %v307_v11 = vadd.f32 %v680_v2, %v306_v10  ;;  %v502_v2 = vld [vmem:[#allocation14 + $0x58] sm:$0xff] }
 0x15b   :  { %515 = vmatpush.msrb.mxu2 %v502_v2  ;;  %v581_v2 = vld [vmem:[#allocation17] sm:$0xff] }
 0x15c   :  { %v310_v12 = vmax.f32 %v307_v11, 0.0 }
 0x15d   :  { %516 = vmatpush.msrb.mxu2 %v501_v3  ;;  %v686_v3 = vld [vmem:[%s1188_s16] ss:$0 sm:$0xff]  ;;  %s632_s16 = sshll.u32 %s1191_s19, 4  ;;  %s633_s16 = int_to_ptr.hbm [resolvable:$true] %s632_s16 }
 0x15e   :  { %350 = vmatmul.f32.gmra.mxu2 %v310_v12  ;;  %v495_v12 = vld [vmem:[#allocation14 + $0x20] sm:$0xff] }
 0x15f   :  { %517 = vmatpush.msrb.mxu2 %v500_v4 }
 0x161   :  { %518 = vmatpush.msrb.mxu2 %v499_v5 }
 0x163   :  { %519 = vmatpush.msrb.mxu2 %v498_v6 }
 0x165   :  { %520 = vmatpush.msrb.mxu2 %v497_v8 }
 0x167   :  { %521 = vmatpush.msrb.mxu2 %v496_v9 }
 0x169   :  { %522 = vmatpush.msrb.mxu2 %v495_v12 }
 0x16b   :  { %523 = vmatpush.msrb.mxu2 %v494_v14 }
 0x16d   :  { %524 = vmatpush.msrb.mxu2 %v493_v18 }
 0x16f   :  { %525 = vmatpush.msrb.mxu2 %v492_v19 }
 0x171   :  { %526 = vmatpush.msrb.mxu2 %v491_v20 }
 0x1d9   :  { %v348_v28 = vpop.f32.mrf.mxu2 }
 0x1da   :  { %v349_v29 = vadd.f32 %v681_v25, %v348_v28  ;;  %v544_v28 = vld [vmem:[#allocation16 + $0x40] sm:$0xff] }
 0x1dc   :  { %v354_v31 = vmax.f32 %v349_v29, 0.0  ;;  %v543_v29 = vld [vmem:[#allocation16 + $0x38] sm:$0xff] }
 0x1de   :  { %392 = vmatmul.f32.vlgmr.msra.gmra.mxu3 %v354_v31  ;;  %v542_v31 = vld [vmem:[#allocation16 + $0x30] sm:$0xff] }
 0x1e1   :  { %v351_v33 = vpop.f32.mrf.mxu2 }
 0x1e2   :  { %v352_v34 = vadd.f32 %v681_v25, %v351_v33  ;;  %v547_v25 = vld [vmem:[#allocation16 + $0x58] sm:$0xff] }
 0x1e3   :  { %560 = vmatpush.msrb.mxu3 %v547_v25 }
 0x1e4   :  { %v355_v35 = vmax.f32 %v352_v34, 0.0 }
 0x1e5   :  { %561 = vmatpush.msrb.mxu3 %v546_v26 }
 0x1e6   :  { %395 = vmatmul.f32.gmra.mxu3 %v355_v35  ;;  %v540_v35 = vld [vmem:[#allocation16 + $0x20] sm:$0xff] }
 0x1e7   :  { %562 = vmatpush.msrb.mxu3 %v545_v27 }
 0x1e9   :  { %563 = vmatpush.msrb.mxu3 %v544_v28 }
 0x1eb   :  { %564 = vmatpush.msrb.mxu3 %v543_v29 }
 0x1ed   :  { %565 = vmatpush.msrb.mxu3 %v542_v31 }
 0x1ef   :  { %566 = vmatpush.msrb.mxu3 %v541_v32 }
 0x1f1   :  { %567 = vmatpush.msrb.mxu3 %v540_v35 }
 0x1f3   :  { %568 = vmatpush.msrb.mxu3 %v539_v37 }
 0x1f5   :  { %569 = vmatpush.msrb.mxu3 %v538_v41 }
 0x1f7   :  { %570 = vmatpush.msrb.mxu3 %v537_v42 }
 0x1f9   :  { %571 = vmatpush.msrb.mxu3 %v536_v43 }
 0x261   :  { %v393_v51 = vpop.f32.mrf.mxu3 }
 0x262   :  { %v394_v52 = vadd.f32 %v682_v48, %v393_v51  ;;  %v589_v51 = vld [vmem:[#allocation17 + $0x40] sm:$0xff] }
 0x264   :  { %v399_v54 = vmax.f32 %v394_v52, 0.0  ;;  %v588_v52 = vld [vmem:[#allocation17 + $0x38] sm:$0xff] }
 0x266   :  { %437 = vmatmul.f32.vlgmr.msrb.gmra.mxu0 %v399_v54  ;;  %v587_v54 = vld [vmem:[#allocation17 + $0x30] sm:$0xff] }
 0x269   :  { %v396_v56 = vpop.f32.mrf.mxu3 }
 0x26a   :  { %v397_v57 = vadd.f32 %v682_v48, %v396_v56  ;;  %v592_v48 = vld [vmem:[#allocation17 + $0x58] sm:$0xff] }
 0x26b   :  { %605 = vmatpush.msra.mxu0 %v592_v48  ;;  %654 = vmatpush.msra.mxu1 %v592_v48 }
 0x26c   :  { %v400_v58 = vmax.f32 %v397_v57, 0.0 }
 0x26d   :  { %606 = vmatpush.msra.mxu0 %v591_v49  ;;  %655 = vmatpush.msra.mxu1 %v591_v49 }
 0x26e   :  { %440 = vmatmul.f32.gmra.mxu0 %v400_v58  ;;  %v585_v58 = vld [vmem:[#allocation17 + $0x20] sm:$0xff] }
 0x26f   :  { %607 = vmatpush.msra.mxu0 %v590_v50  ;;  %656 = vmatpush.msra.mxu1 %v590_v50 }
 0x271   :  { %608 = vmatpush.msra.mxu0 %v589_v51  ;;  %657 = vmatpush.msra.mxu1 %v589_v51 }
 0x273   :  { %609 = vmatpush.msra.mxu0 %v588_v52  ;;  %658 = vmatpush.msra.mxu1 %v588_v52 }
 0x275   :  { %610 = vmatpush.msra.mxu0 %v587_v54  ;;  %659 = vmatpush.msra.mxu1 %v587_v54 }
 0x277   :  { %611 = vmatpush.msra.mxu0 %v586_v55  ;;  %660 = vmatpush.msra.mxu1 %v586_v55 }
 0x279   :  { %612 = vmatpush.msra.mxu0 %v585_v58  ;;  %661 = vmatpush.msra.mxu1 %v585_v58 }
 0x27b   :  { %613 = vmatpush.msra.mxu0 %v584_v60  ;;  %662 = vmatpush.msra.mxu1 %v584_v60 }
 0x27d   :  { %614 = vmatpush.msra.mxu0 %v583_v0  ;;  %663 = vmatpush.msra.mxu1 %v583_v0 }
 0x27f   :  { %615 = vmatpush.msra.mxu0 %v582_v1  ;;  %664 = vmatpush.msra.mxu1 %v582_v1 }
 0x281   :  { %616 = vmatpush.msra.mxu0 %v581_v2  ;;  %665 = vmatpush.msra.mxu1 %v581_v2 }
 0x2e3   :  { %v438_v10 = vpop.f32.mrf.mxu0 }
 0x2e4   :  { %v439_v11 = vadd.f32 %v683_v7, %v438_v10  ;;  %v687_v10 = vld [vmem:[%s1190_s18] ss:$0 sm:$0xff] }
 0x2e6   :  { %v444_v13 = vmax.f32 %v439_v11, 0.0 }
 0x2e8   :  { %482 = vmatmul.f32.vlgmr.msrb.gmra.mxu1 %v444_v13 }
 0x2eb   :  { %v441_v15 = vpop.f32.mrf.mxu0 }
 0x2ec   :  { %v442_v16 = vadd.f32 %v683_v7, %v441_v15 }
 0x2ee   :  { %v445_v17 = vmax.f32 %v442_v16, 0.0 }
 0x2f0   :  { %485 = vmatmul.f32.gmra.mxu1 %v445_v17 }
 0x365   :  { %v483_v33 = vpop.f32.mrf.mxu1 }
 0x366   :  { %v484_v34 = vadd.f32 %v684_v30, %v483_v33 }
 0x368   :  { %v489_v36 = vmax.f32 %v484_v34, 0.0 }
 0x36a   :  { %527 = vmatmul.f32.vlgmr.msrb.gmra.mxu2 %v489_v36 }
 0x36d   :  { %v486_v38 = vpop.f32.mrf.mxu1 }
 0x36e   :  { %v487_v39 = vadd.f32 %v684_v30, %v486_v38 }
 0x370   :  { %v490_v40 = vmax.f32 %v487_v39, 0.0 }
 0x372   :  { %530 = vmatmul.f32.gmra.mxu2 %v490_v40 }
 0x3ed   :  { %v528_v56 = vpop.f32.mrf.mxu2 }
 0x3ee   :  { %v529_v57 = vadd.f32 %v685_v53, %v528_v56 }
 0x3f0   :  { %v534_v59 = vmax.f32 %v529_v57, 0.0 }
 0x3f2   :  { %572 = vmatmul.f32.vlgmr.msrb.gmra.mxu3 %v534_v59 }
 0x3f5   :  { %v531_v61 = vpop.f32.mrf.mxu2 }
 0x3f6   :  { %v532_v62 = vadd.f32 %v685_v53, %v531_v61 }
 0x3f8   :  { %v535_v63 = vmax.f32 %v532_v62, 0.0 }
 0x3fa   :  { %575 = vmatmul.f32.gmra.mxu3 %v535_v63 }
 0x475   :  { %v573_v4 = vpop.f32.mrf.mxu3 }
 0x476   :  { %v574_v5 = vadd.f32 %v686_v3, %v573_v4 }
 0x478   :  { %v579_v6 = vmax.f32 %v574_v5, 0.0 }
 0x47a   :  { %617 = vmatmul.f32.vlgmr.msra.gmra.mxu0 %v579_v6 }
 0x47d   :  { %v576_v7 = vpop.f32.mrf.mxu3 }
 0x47e   :  { %v577_v8 = vadd.f32 %v686_v3, %v576_v7 }
 0x480   :  { %v580_v9 = vmax.f32 %v577_v8, 0.0 }
 0x482   :  { %620 = vmatmul.f32.vlgmr.msra.gmra.mxu1 %v580_v9 }
 0x4f7   :  { %v618_v11 = vpop.f32.mrf.mxu0 }
 0x4f8   :  { %v619_v12 = vadd.f32 %v687_v10, %v618_v11 }
 0x4fa   :  { %624 = vst [vmem:[#allocation19] sm:$0xff] %v619_v12 }
 0x4ff   :  { %v621_v13 = vpop.f32.mrf.mxu1 }
 0x500   :  { %v622_v14 = vadd.f32 %v687_v10, %v621_v13 }
 0x502   :  { %625 = vst [vmem:[#allocation19 + $0x8] sm:$0xff] %v622_v14 }
 0x503   :  { %638 = dma.vmem_to_hbm [thread:$0]  %s631_s29, 256, %s633_s16, [#allocation4], %s967_s25, %s967_s25, %s968_s3  }
 0x504   :  { %964 = dma.done.wait [#allocation4], 256  }
 0x505   :  { %965 = vsyncadd [#allocation4], 4294967040 }
 0x506   :  { %643 = vsyncpa [#allocation3], 1 }
 0x507   :  { %644 = vsyncpa [#allocation6], 1 }
 0x508   :  { %645 = vsyncpa [#allocation9], 1 }
 0x509   :  { %646 = vsyncpa [#allocation12], 1 }
 0x50a   :  { %647 = vsyncpa [#allocation15], 1 }
 0x50b   :  { %648 = vsyncpa [#allocation18], 1 }
 0x50c   :  { %649 = vsyncpa [#allocation4], 1 }

</bundles_post_ra>
